<compile_context>
chip_gen: v5e
topology: v5e:2x2
jax: 0.10.0
libtpu: 0.0.40
codegen_flags: <defaults>
</compile_context>

<pallas_src>
import functools

import jax
import jax.numpy as jnp
from jax import lax
from jax.experimental import pallas as pl
from jax.experimental.pallas import tpu as pltpu

_MIB = 1024 * 1024


def _round_up(n, m):
    return ((n + m - 1) // m) * m


def _cdiv(a, b):
    return -(-a // b)


def _vmem_budget_bytes():
    """Usable VMEM per core, generation-aware, with headroom for Mosaic."""
    try:
        cap = int(pltpu.get_tpu_info().vmem_capacity_bytes)
    except Exception:
        cap = 64 * _MIB  # conservative fallback, valid on every generation
    # v7x: 64 MiB/TC -> ~56 MiB usable.  v5e/v6e: 128 MiB -> ~104 MiB usable.
    headroom = 8 * _MIB if cap <= 64 * _MIB else 24 * _MIB
    return max(32 * _MIB, cap - headroom)


def _pick_divisor_tile(h_dim, req):
    """Largest multiple of 128 that divides h_dim and is <= req; else h_dim."""
    t = min(_round_up(req, 128), h_dim)
    t = (t // 128) * 128
    while t >= 128:
        if h_dim % t == 0:
            return t
        t -= 128
    return h_dim


def _gelu_tanh(x):
    # Exact match of torch.nn.GELU(approximate='tanh'), computed in f32.
    c = 0.7978845608028654  # sqrt(2/pi)
    return 0.5 * x * (1.0 + jnp.tanh(c * (x + 0.044715 * x * x * x)))


# ----------------------------------------------------------------------------
# Kernels
# ----------------------------------------------------------------------------
def _mlp_kernel_resident(x_ref, wfc_ref, bfc_ref, wpr_ref, bpr_ref, o_ref,
                         acc_ref, *, kh, n_chunks):
    # x_ref: (tm, C)  wfc_ref: (C, H)  bfc_ref: (1, H)  wpr_ref: (H, C)
    # bpr_ref: (1, C)  o_ref: (tm, C)  acc_ref: (tm, C) f32 scratch.
    # Cast the activation tile in-kernel (no wrapper-side HBM convert).
    x = x_ref[...].astype(wfc_ref.dtype)
    acc_ref[...] = jnp.zeros_like(acc_ref)

    def chunk(k, carry):
        # kh is a multiple of 128 whenever n_chunks > 1 (see _pick_divisor_tile).
        off = pl.multiple_of(k * kh, 128 if kh % 128 == 0 else 8)
        h = jnp.dot(x, wfc_ref[:, pl.ds(off, kh)],
                    preferred_element_type=jnp.float32)
        h = _gelu_tanh(h + bfc_ref[:, pl.ds(off, kh)])
        acc_ref[...] += jnp.dot(h.astype(wpr_ref.dtype),
                                wpr_ref[pl.ds(off, kh), :],
                                preferred_element_type=jnp.float32)
        return carry

    # Unrolled H-chunk loop: slice k+1's fc matmul overlaps slice k's GELU,
    # and the (tm, H) intermediate never materializes.
    lax.fori_loop(0, n_chunks, chunk, 0, unroll=(n_chunks <= 8))

    o_ref[...] = (acc_ref[...] + bpr_ref[...]).astype(o_ref.dtype)


def _mlp_kernel_htiled(x_ref, wfc_ref, bfc_ref, wpr_ref, bpr_ref, o_ref,
                       acc_ref):
    # Streamed hidden chunks: out = sum_k gelu(x @ Wfc[:,k] + bfc[k]) @ Wpr[k,:]
    k = pl.program_id(1)

    @pl.when(k == 0)
    def _():
        acc_ref[...] = jnp.zeros_like(acc_ref)

    x = x_ref[...].astype(wfc_ref.dtype)
    h = jnp.dot(x, wfc_ref[...], preferred_element_type=jnp.float32)
    h = _gelu_tanh(h + bfc_ref[...])
    acc_ref[...] += jnp.dot(h.astype(wpr_ref.dtype), wpr_ref[...],
                            preferred_element_type=jnp.float32)

    @pl.when(k == pl.num_programs(1) - 1)
    def _():
        o_ref[...] = (acc_ref[...] + bpr_ref[...]).astype(o_ref.dtype)


# ----------------------------------------------------------------------------
# pallas_call builders
# ----------------------------------------------------------------------------
def _mlp_resident(x2d, wfc, bfc, wpr, bpr, *, tm, kh, out_dtype, vmem_cap,
                  single_buffer_weights):
    M, C = x2d.shape
    H = wfc.shape[1]
    wbytes = jnp.dtype(wfc.dtype).itemsize
    xbytes = jnp.dtype(x2d.dtype).itemsize
    obytes = jnp.dtype(out_dtype).itemsize
    nbuf = 1 if single_buffer_weights else 2
    n_chunks = H // kh

    # Constant-index weight/bias blocks: single-buffer when supported to halve
    # their VMEM footprint (weights are re-used every row tile anyway).
    w_kwargs = (dict(pipeline_mode=pl.Buffered(1))
                if single_buffer_weights else {})

    vmem_need = (
        2 * C * H * wbytes * nbuf + (H + C) * 4 * nbuf   # weights + biases
        + 2 * tm * C * xbytes + 2 * tm * C * obytes      # pipelined x / out
        + tm * C * (4 + wbytes)                          # acc scratch + x cast
        + tm * kh * (4 + wbytes)                         # per-chunk hidden slab
    )
    vmem_limit = int(min(max(int(1.3 * vmem_need) + 2 * _MIB, 32 * _MIB),
                         vmem_cap))

    kernel = functools.partial(_mlp_kernel_resident, kh=kh, n_chunks=n_chunks)

    return pl.pallas_call(
        kernel,
        out_shape=jax.ShapeDtypeStruct((M, C), out_dtype),
        grid_spec=pltpu.PrefetchScalarGridSpec(
            num_scalar_prefetch=0,
            grid=(_cdiv(M, tm),),
            in_specs=[
                pl.BlockSpec((tm, C), lambda i: (i, 0)),              # x tile
                pl.BlockSpec((C, H), lambda i: (0, 0), **w_kwargs),   # W_fc
                pl.BlockSpec((1, H), lambda i: (0, 0), **w_kwargs),   # b_fc
                pl.BlockSpec((H, C), lambda i: (0, 0), **w_kwargs),   # W_proj
                pl.BlockSpec((1, C), lambda i: (0, 0), **w_kwargs),   # b_proj
            ],
            out_specs=pl.BlockSpec((tm, C), lambda i: (i, 0)),
            scratch_shapes=[pltpu.VMEM((tm, C), jnp.float32)],
        ),
        compiler_params=pltpu.CompilerParams(
            dimension_semantics=("parallel",),
            vmem_limit_bytes=vmem_limit,
        ),
    )(x2d, wfc, bfc, wpr, bpr)


def _mlp_htiled(x2d, wfc, bfc, wpr, bpr, *, tm, th, out_dtype, vmem_cap):
    M, C = x2d.shape
    H = wfc.shape[1]
    assert H % th == 0, "hidden tile must divide H"
    wbytes = jnp.dtype(wfc.dtype).itemsize
    xbytes = jnp.dtype(x2d.dtype).itemsize
    obytes = jnp.dtype(out_dtype).itemsize

    vmem_need = (
        2 * 2 * C * th * wbytes + 2 * (th + C) * 4   # double-buffered w/b chunks
        + 2 * tm * C * xbytes + 2 * tm * C * obytes  # pipelined x / out tiles
        + tm * C * (4 + wbytes)                      # acc scratch + x cast
        + tm * th * (4 + wbytes)                     # hidden chunk (f32 + cast)
    )
    vmem_limit = int(min(max(int(1.3 * vmem_need) + 2 * _MIB, 32 * _MIB),
                         vmem_cap))

    return pl.pallas_call(
        _mlp_kernel_htiled,
        out_shape=jax.ShapeDtypeStruct((M, C), out_dtype),
        grid_spec=pltpu.PrefetchScalarGridSpec(
            num_scalar_prefetch=0,
            grid=(_cdiv(M, tm), H // th),            # k (reduction) axis last
            in_specs=[
                pl.BlockSpec((tm, C), lambda i, k: (i, 0)),   # x (resident over k)
                pl.BlockSpec((C, th), lambda i, k: (0, k)),   # W_fc column chunk
                pl.BlockSpec((1, th), lambda i, k: (0, k)),   # b_fc chunk
                pl.BlockSpec((th, C), lambda i, k: (k, 0)),   # W_proj row chunk
                pl.BlockSpec((1, C), lambda i, k: (0, 0)),    # b_proj
            ],
            out_specs=pl.BlockSpec((tm, C), lambda i, k: (i, 0)),
            scratch_shapes=[pltpu.VMEM((tm, C), jnp.float32)],
        ),
        compiler_params=pltpu.CompilerParams(
            dimension_semantics=("parallel", "arbitrary"),
            vmem_limit_bytes=vmem_limit,
        ),
    )(x2d, wfc, bfc, wpr, bpr)


# ----------------------------------------------------------------------------
# Public wrappers
# ----------------------------------------------------------------------------
def prepare_mlp_params(w_fc, b_fc, w_proj, b_proj, *, weight_dtype=jnp.bfloat16):
    """Cast weights ONCE (cache the result across calls).

    Passing pre-cast bf16 weights avoids a per-call f32->bf16 HBM convert of
    the full weight matrices; biases stay f32 (added in f32 in-kernel)."""
    return (w_fc.astype(weight_dtype), b_fc.astype(jnp.float32),
            w_proj.astype(weight_dtype), b_proj.astype(jnp.float32))


def mlp_forward(x, w_fc, b_fc, w_proj, b_proj, *, tm=256, th=512, kh=512,
                force_h_tiled=False, force_resident=False):
    """GPT-2 MLP forward.  x: (B, T, C).  w_fc: (C, 4C), w_proj: (4C, C).

    Weights are used in whatever dtype they arrive in (use prepare_mlp_params
    to pre-cast to bf16); x is cast to the weight dtype inside the kernel."""
    B, T, C = x.shape
    H = w_fc.shape[1]
    M = B * T
    out_dtype = x.dtype

    x2d = x.reshape(M, C)                                  # no dtype cast here
    bfc = b_fc.reshape(1, H).astype(jnp.float32)
    bpr = b_proj.reshape(1, C).astype(jnp.float32)

    vmem_cap = _vmem_budget_bytes()
    wbytes = jnp.dtype(w_fc.dtype).itemsize
    xbytes = jnp.dtype(x.dtype).itemsize
    obytes = jnp.dtype(out_dtype).itemsize

    # Row tile: multiple of the 256-wide MXU tile (v6e/v7x) for large M,
    # clamped/rounded to the 8-row sublane for tiny inputs.
    # TODO(synk): per-chip sweep (v5e's 128-wide MXU may prefer tm/row_mult=128).
    row_mult = 256 if M >= 256 else 8
    tm = max(8, min(_round_up(tm, row_mult), _round_up(M, 8)))
    # Keep >=2 "parallel" row tiles when M allows (v7x megacore coverage).
    if M >= 2 * row_mult and _cdiv(M, tm) < 2:
        tm = max(row_mult, _round_up(_cdiv(M, 2), row_mult))

    kh_res = _pick_divisor_tile(H, kh)    # in-kernel hidden chunk (resident)
    th_str = _pick_divisor_tile(H, th)    # streamed hidden chunk (H-tiled)

    # Dispatch: resident weights if they fit (budgeted for default
    # double-buffering) AND there are enough row tiles to hide the full-weight
    # prologue DMA; otherwise stream hidden chunks (overlaps weight DMA).
    resident_need = (
        2 * C * H * wbytes * 2 + (H + C) * 4 * 2
        + 2 * tm * C * xbytes + 2 * tm * C * obytes
        + tm * C * (4 + wbytes) + tm * kh_res * (4 + wbytes)
    )
    weights_fit = int(1.3 * resident_need) + 2 * _MIB <= vmem_cap
    use_resident = force_resident or (
        not force_h_tiled and weights_fit and _cdiv(M, tm) >= 3)

    if use_resident:
        try:
            out2d = _mlp_resident(x2d, w_fc, bfc, w_proj, bpr, tm=tm, kh=kh_res,
                                  out_dtype=out_dtype, vmem_cap=vmem_cap,
                                  single_buffer_weights=True)
        except Exception:
            # pl.Buffered(1) unsupported on this jax/Mosaic version; the
            # double-buffered footprint was already verified to fit above, so
            # retrying cannot hide a genuine VMEM OOM.
            out2d = _mlp_resident(x2d, w_fc, bfc, w_proj, bpr, tm=tm, kh=kh_res,
                                  out_dtype=out_dtype, vmem_cap=vmem_cap,
                                  single_buffer_weights=False)
    else:
        # H-tiled row tile is decoupled from the resident tm: as large as the
        # VMEM budget allows, since weight HBM traffic scales with M/tm.
        m_cap = _round_up(M, 8)
        tm_h = 8
        for cand in (2048, 1536, 1024, 768, 512, 384, 256, 128, 64, 32, 16, 8):
            tmc = min(cand, m_cap)
            need = (2 * 2 * C * th_str * wbytes + 2 * (th_str + C) * 4
                    + 2 * tmc * C * xbytes + 2 * tmc * C * obytes
                    + tmc * C * (4 + wbytes) + tmc * th_str * (4 + wbytes))
            if int(1.3 * need) + 2 * _MIB <= vmem_cap:
                tm_h = max(8, tmc)
                break
        if M >= 512 and _cdiv(M, tm_h) < 2:     # v7x megacore coverage
            tm_h = max(256, _round_up(_cdiv(M, 2), 256))
        out2d = _mlp_htiled(x2d, w_fc, bfc, w_proj, bpr, tm=tm_h, th=th_str,
                            out_dtype=out_dtype, vmem_cap=vmem_cap)

    return out2d.reshape(B, T, C)


def reference_mlp(x, w_fc, b_fc, w_proj, b_proj):
    h = _gelu_tanh(jnp.einsum("btc,ch->bth", x, w_fc) + b_fc)
    return jnp.einsum("bth,hc->btc", h, w_proj) + b_proj


if __name__ == "__main__":
    # Small config consistent with the module: n_embd = 64 -> hidden = 256.
    B, T, C = 2, 8, 64
    H = 4 * C

    key = jax.random.PRNGKey(0)
    kx, kw1, kb1, kw2, kb2 = jax.random.split(key, 5)

    x = jax.random.normal(kx, (B, T, C), dtype=jnp.float32)
    w_fc = jax.random.normal(kw1, (C, H), dtype=jnp.float32) * (1.0 / jnp.sqrt(C))
    b_fc = jax.random.normal(kb1, (H,), dtype=jnp.float32) * 0.01
    w_proj = jax.random.normal(kw2, (H, C), dtype=jnp.float32) * (1.0 / jnp.sqrt(H))
    b_proj = jax.random.normal(kb2, (C,), dtype=jnp.float32) * 0.01

    ref = reference_mlp(x, w_fc, b_fc, w_proj, b_proj)

    # Cast weights ONCE (intended usage: cache these across steps).
    wfc_b, bfc_f, wpr_b, bpr_f = prepare_mlp_params(w_fc, b_fc, w_proj, b_proj)

    # Default dispatch: at this tiny M the H-tiled streaming path is chosen.
    out = jax.block_until_ready(mlp_forward(x, wfc_b, bfc_f, wpr_b, bpr_f))
    assert out.shape == (B, T, C)
    assert jnp.allclose(out, ref, atol=3e-2, rtol=3e-2), "h-tiled path mismatch"

    # Resident-weight path (what large-M training shapes use), bf16 weights.
    out_r = jax.block_until_ready(
        mlp_forward(x, wfc_b, bfc_f, wpr_b, bpr_f, force_resident=True))
    assert jnp.allclose(out_r, ref, atol=3e-2, rtol=3e-2), "resident path mismatch"

    # Resident path with f32 weights (no bf16 rounding) -> tight tolerance.
    out_f = jax.block_until_ready(
        mlp_forward(x, w_fc, b_fc, w_proj, b_proj, force_resident=True))
    assert jnp.allclose(out_f, ref, atol=1e-4, rtol=1e-4), "f32 path mismatch"

    print("KERNEL_OK")
</pallas_src>

<mosaic_0001>
module attributes {stable_mosaic.version = 11 : i64} {
  func.func @_mlp_kernel_htiled(%arg0: i32, %arg1: i32, %arg2: memref<16x64xf32, #tpu.memory_space<vmem>>, %arg3: memref<64x256xbf16, #tpu.memory_space<vmem>>, %arg4: memref<1x256xf32, #tpu.memory_space<vmem>>, %arg5: memref<256x64xbf16, #tpu.memory_space<vmem>>, %arg6: memref<1x64xf32, #tpu.memory_space<vmem>>, %arg7: memref<16x64xf32, #tpu.memory_space<vmem>>, %arg8: memref<16x64xf32, #tpu.memory_space<vmem>>) attributes {dimension_semantics = [#tpu.dimension_semantics<parallel>, #tpu.dimension_semantics<arbitrary>], iteration_bounds = array<i64: 1, 1>, scalar_prefetch = 0 : i64, scratch_operands = 1 : i64, tpu.core_type = #tpu.core_type<tc>, window_params = [{transform_indices = @transform_0, window_bounds = array<i64: 16, 64>}, {transform_indices = @transform_1, window_bounds = array<i64: 64, 256>}, {transform_indices = @transform_2, window_bounds = array<i64: 1, 256>}, {transform_indices = @transform_3, window_bounds = array<i64: 256, 64>}, {pipeline_mode = #tpu.pipeline_mode<synchronous>, transform_indices = @transform_4, window_bounds = array<i64: 1, 64>}, {transform_indices = @transform_5, window_bounds = array<i64: 16, 64>}]} {
    %c0_i32 = arith.constant 0 : i32
    %0 = arith.cmpi eq, %arg1, %c0_i32 : i32
    %1 = arith.extui %0 : i1 to i32
    %c0_i32_0 = arith.constant 0 : i32
    %2 = arith.cmpi ne, %1, %c0_i32_0 : i32
    scf.if %2 {
      %cst_19 = arith.constant 0.000000e+00 : f32
      %32 = vector.broadcast %cst_19 : f32 to vector<16x64xf32>
      %c0_20 = arith.constant 0 : index
      %c0_21 = arith.constant 0 : index
      %33 = vector.load %arg8[%c0_20, %c0_21] : memref<16x64xf32, #tpu.memory_space<vmem>>, vector<16x64xf32>
      tpu.vector_store %arg8[%c0_20, %c0_21], %32 {strides = array<i32>} : memref<16x64xf32, #tpu.memory_space<vmem>>, vector<16x64xf32>,
    } else {
    }
    %c0 = arith.constant 0 : index
    %c0_1 = arith.constant 0 : index
    %3 = vector.load %arg2[%c0, %c0_1] : memref<16x64xf32, #tpu.memory_space<vmem>>, vector<16x64xf32>
    %4 = arith.truncf %3 : vector<16x64xf32> to vector<16x64xbf16>
    %c0_2 = arith.constant 0 : index
    %c0_3 = arith.constant 0 : index
    %5 = vector.load %arg3[%c0_2, %c0_3] : memref<64x256xbf16, #tpu.memory_space<vmem>>, vector<64x256xbf16>
    %cst = arith.constant dense<0.000000e+00> : vector<16x256xf32>
    %6 = tpu.matmul %4, %5, %cst {dimension_numbers = #tpu.dot_dimension_numbers<[1], [0], [0], [1], [0, 0, 1, 1], [], []>} : vector<16x64xbf16>, vector<64x256xbf16>, vector<16x256xf32> -> vector<16x256xf32>
    %c0_4 = arith.constant 0 : index
    %c0_5 = arith.constant 0 : index
    %7 = vector.load %arg4[%c0_4, %c0_5] : memref<1x256xf32, #tpu.memory_space<vmem>>, vector<1x256xf32>
    %8 = vector.broadcast %7 : vector<1x256xf32> to vector<16x256xf32>
    %9 = arith.addf %6, %8 : vector<16x256xf32>
    %cst_6 = arith.constant 5.000000e-01 : f32
    %10 = vector.broadcast %cst_6 : f32 to vector<16x256xf32>
    %11 = arith.mulf %10, %9 : vector<16x256xf32>
    %cst_7 = arith.constant 4.471500e-02 : f32
    %12 = vector.broadcast %cst_7 : f32 to vector<16x256xf32>
    %13 = arith.mulf %12, %9 : vector<16x256xf32>
    %14 = arith.mulf %13, %9 : vector<16x256xf32>
    %15 = arith.mulf %14, %9 : vector<16x256xf32>
    %16 = arith.addf %9, %15 : vector<16x256xf32>
    %cst_8 = arith.constant 0.797884583 : f32
    %17 = vector.broadcast %cst_8 : f32 to vector<16x256xf32>
    %18 = arith.mulf %17, %16 : vector<16x256xf32>
    %19 = math.tanh %18 : vector<16x256xf32>
    %cst_9 = arith.constant 1.000000e+00 : f32
    %20 = vector.broadcast %cst_9 : f32 to vector<16x256xf32>
    %21 = arith.addf %20, %19 : vector<16x256xf32>
    %22 = arith.mulf %11, %21 : vector<16x256xf32>
    %c0_10 = arith.constant 0 : index
    %c0_11 = arith.constant 0 : index
    %23 = vector.load %arg8[%c0_10, %c0_11] : memref<16x64xf32, #tpu.memory_space<vmem>>, vector<16x64xf32>
    %24 = arith.truncf %22 : vector<16x256xf32> to vector<16x256xbf16>
    %c0_12 = arith.constant 0 : index
    %c0_13 = arith.constant 0 : index
    %25 = vector.load %arg5[%c0_12, %c0_13] : memref<256x64xbf16, #tpu.memory_space<vmem>>, vector<256x64xbf16>
    %cst_14 = arith.constant dense<0.000000e+00> : vector<16x64xf32>
    %26 = tpu.matmul %24, %25, %cst_14 {dimension_numbers = #tpu.dot_dimension_numbers<[1], [0], [0], [1], [0, 0, 1, 1], [], []>} : vector<16x256xbf16>, vector<256x64xbf16>, vector<16x64xf32> -> vector<16x64xf32>
    %27 = arith.addf %23, %26 : vector<16x64xf32>
    %c0_15 = arith.constant 0 : index
    %c0_16 = arith.constant 0 : index
    %28 = vector.load %arg8[%c0_15, %c0_16] : memref<16x64xf32, #tpu.memory_space<vmem>>, vector<16x64xf32>
    tpu.vector_store %arg8[%c0_15, %c0_16], %27 {strides = array<i32>} : memref<16x64xf32, #tpu.memory_space<vmem>>, vector<16x64xf32>,
    %c0_i32_17 = arith.constant 0 : i32
    %29 = arith.cmpi eq, %arg1, %c0_i32_17 : i32
    %30 = arith.extui %29 : i1 to i32
    %c0_i32_18 = arith.constant 0 : i32
    %31 = arith.cmpi ne, %30, %c0_i32_18 : i32
    scf.if %31 {
      %c0_19 = arith.constant 0 : index
      %c0_20 = arith.constant 0 : index
      %32 = vector.load %arg8[%c0_19, %c0_20] : memref<16x64xf32, #tpu.memory_space<vmem>>, vector<16x64xf32>
      %c0_21 = arith.constant 0 : index
      %c0_22 = arith.constant 0 : index
      %33 = vector.load %arg6[%c0_21, %c0_22] : memref<1x64xf32, #tpu.memory_space<vmem>>, vector<1x64xf32>
      %34 = vector.broadcast %33 : vector<1x64xf32> to vector<16x64xf32>
      %35 = arith.addf %32, %34 : vector<16x64xf32>
      %c0_23 = arith.constant 0 : index
      %c0_24 = arith.constant 0 : index
      %36 = vector.load %arg7[%c0_23, %c0_24] : memref<16x64xf32, #tpu.memory_space<vmem>>, vector<16x64xf32>
      tpu.vector_store %arg7[%c0_23, %c0_24], %35 {strides = array<i32>} : memref<16x64xf32, #tpu.memory_space<vmem>>, vector<16x64xf32>,
    } else {
    }
    return
  }
  func.func @transform_0(%arg0: i32, %arg1: i32) -> (i32, i32) {
    %c0_i32 = arith.constant 0 : i32
    %c0_i32_0 = arith.constant 0 : i32
    return %arg0, %c0_i32 : i32, i32
  }
  func.func @transform_1(%arg0: i32, %arg1: i32) -> (i32, i32) {
    %c0_i32 = arith.constant 0 : i32
    %c0_i32_0 = arith.constant 0 : i32
    return %c0_i32, %arg1 : i32, i32
  }
  func.func @transform_2(%arg0: i32, %arg1: i32) -> (i32, i32) {
    %c0_i32 = arith.constant 0 : i32
    %c0_i32_0 = arith.constant 0 : i32
    return %c0_i32, %arg1 : i32, i32
  }
  func.func @transform_3(%arg0: i32, %arg1: i32) -> (i32, i32) {
    %c0_i32 = arith.constant 0 : i32
    %c0_i32_0 = arith.constant 0 : i32
    return %arg1, %c0_i32 : i32, i32
  }
  func.func @transform_4(%arg0: i32, %arg1: i32) -> (i32, i32) {
    %c0_i32 = arith.constant 0 : i32
    %c0_i32_0 = arith.constant 0 : i32
    %c0_i32_1 = arith.constant 0 : i32
    return %c0_i32, %c0_i32_0 : i32, i32
  }
  func.func @transform_5(%arg0: i32, %arg1: i32) -> (i32, i32) {
    %c0_i32 = arith.constant 0 : i32
    %c0_i32_0 = arith.constant 0 : i32
    return %arg0, %c0_i32 : i32, i32
  }
}

</mosaic_0001>

<bundles_post_ra>
// kernel: tpu_custom_call.1
= control target key start
LH: loop header
LB: loop body
LE: loop exit
PB: predicated region body
PF: predicated region fallthrough
CT: control target
= control target key end

     0   :  { %s663_s0 = inlined_call_operand.vmem [shape: f32[16,64], index: 0, kind: input, shape index: {}]   ;;  %s664_s1 = inlined_call_operand.vmem [shape: bf16[64,256], index: 1, kind: input, shape index: {}]   ;;  %s665_s2 = inlined_call_operand.vmem [shape: f32[1,256], index: 2, kind: input, shape index: {}]   ;;  %s666_s3 = inlined_call_operand.vmem [shape: bf16[256,64], index: 3, kind: input, shape index: {}]   ;;  %s667_s4 = inlined_call_operand.vmem [shape: f32[1,64], index: 4, kind: input, shape index: {}]   ;;  %s668_s5 = inlined_call_operand.hbm [shape: f32[16,64], index: 5, kind: output, shape index: {}]  }
   0x1   :  { %v375_v0 = vld [vmem:[%s664_s1 + $0x30] sm:$0xf]  ;;  %v454_v1 = vld [vmem:[%s664_s1 + $0x34] sm:$0xf0]  ;;  %v453_v2 = vld [vmem:[%s664_s1 + $0x34] sm:$0xf] }
   0x2   :  { %v376_v3 = vor.u32 %v454_v1, %v375_v0  ;;  %v377_v4 = vld [vmem:[%s664_s1 + $0x38] sm:$0xf0]  ;;  %v367_v5 = vld [vmem:[%s664_s1 + $0x20] sm:$0xf]  ;;  %v452_v6 = vld [vmem:[%s664_s1 + $0x24] sm:$0xf0] }
   0x3   :  { %v380_v7 = vor.u32 %v453_v2, %v377_v4  ;;  %v451_v8 = vld [vmem:[%s664_s1 + $0x24] sm:$0xf]  ;;  %v369_v9 = vld [vmem:[%s664_s1 + $0x28] sm:$0xf0]  ;;  %v368_v10 = vor.u32 %v452_v6, %v367_v5  ;;  %v359_v12 = vld [vmem:[%s664_s1 + $0x10] sm:$0xf] }
   0x4   :  { %94 = vmatpush.bf16.msra.mxu0 %v376_v3  ;;  %v372_v11 = vor.u32 %v451_v8, %v369_v9  ;;  %v450_v13 = vld [vmem:[%s664_s1 + $0x14] sm:$0xf0]  ;;  %v449_v14 = vld [vmem:[%s664_s1 + $0x14] sm:$0xf]  ;;  %v361_v15 = vld [vmem:[%s664_s1 + $0x18] sm:$0xf0] }
   0x5   :  { %108 = vmatpush.bf16.msra.mxu1 %v380_v7 }
   0x6   :  { %10 = vsyncpa [#allocation4], 0  ;;  %v360_v16 = vor.u32 %v450_v13, %v359_v12  ;;  %v364_v17 = vor.u32 %v449_v14, %v361_v15  ;;  %v351_v18 = vld [vmem:[%s664_s1] sm:$0xf]  ;;  %v448_v19 = vld [vmem:[%s664_s1 + $0x4] sm:$0xf0] }
   0x7   :  { %v447_v20 = vld [vmem:[%s664_s1 + $0x4] sm:$0xf]  ;;  %v353_v21 = vld [vmem:[%s664_s1 + $0x8] sm:$0xf0]  ;;  %v352_v22 = vor.u32 %v448_v19, %v351_v18  ;;  %vm26_vm0 = vcmask 523264   ;;  %v462_v27 = vld [vmem:[%s666_s3 + $0x38] sm:$0xff] }
   0x8   :  { %95 = vmatpush.bf16.msra.mxu0 %v368_v10  ;;  %v29_v23 = vld [vmem:[%s663_s0] sm:$0xff]  ;;  %v30_v24 = vld [vmem:[%s663_s0 + $0x8] sm:$0xff]  ;;  %v356_v25 = vor.u32 %v447_v20, %v353_v21  ;;  %v470_v28 = vld [vmem:[%s666_s3 + $0x78] sm:$0xff]  ;;  %286 = vmatpush.bf16.msra.mxu2 %v462_v27  ;;  %s511_s9 = smov [#allocation3]   ;;  %s337_s13 = sshll.u32 %s668_s5, 4  ;;  %s338_s13 = int_to_ptr.hbm [resolvable:$true] %s337_s13 }
   0x9   :  { %109 = vmatpush.bf16.msra.mxu1 %v372_v11  ;;  %v31_v26 = vpack.c.bf16 %v30_v24, %v29_v23  ;;  %300 = vmatpush.bf16.msra.mxu3 %v470_v28  ;;  %v461_v29 = vld [vmem:[%s666_s3 + $0x30] sm:$0xff]  ;;  %v460_v31 = vld [vmem:[%s666_s3 + $0x28] sm:$0xff]  ;;  %v459_v33 = vld [vmem:[%s666_s3 + $0x20] sm:$0xff]  ;;  %v510_v28 = vmov 0.0   ;;  %s335_s10 = sshll.u32 %s511_s9, 4  ;;  %s513_s14 = smov 8   ;;  %s336_s10 = int_to_ptr.vmem [resolvable:$true] %s335_s10 }
   0xa   :  { %v469_v30 = vld [vmem:[%s666_s3 + $0x70] sm:$0xff]  ;;  %v468_v32 = vld [vmem:[%s666_s3 + $0x68] sm:$0xff]  ;;  %v467_v34 = vld [vmem:[%s666_s3 + $0x60] sm:$0xff]  ;;  %27 = vst.msk [vmem:[#allocation2] sm:$0xff] %vm26_vm0, %v510_v28 }
   0xb   :  { %v458_v35 = vld [vmem:[%s666_s3 + $0x18] sm:$0xff]  ;;  %v457_v37 = vld [vmem:[%s666_s3 + $0x10] sm:$0xff]  ;;  %v456_v39 = vld [vmem:[%s666_s3 + $0x8] sm:$0xff]  ;;  %28 = vst.msk [vmem:[#allocation2 + $0x8] sm:$0xff] %vm26_vm0, %v510_v28 }
   0xc   :  { %96 = vmatpush.bf16.msra.mxu0 %v360_v16  ;;  %287 = vmatpush.bf16.msra.mxu2 %v461_v29  ;;  %v466_v36 = vld [vmem:[%s666_s3 + $0x58] sm:$0xff]  ;;  %v465_v38 = vld [vmem:[%s666_s3 + $0x50] sm:$0xff]  ;;  %v464_v40 = vld [vmem:[%s666_s3 + $0x48] sm:$0xff] }
   0xd   :  { %110 = vmatpush.bf16.msra.mxu1 %v364_v17  ;;  %301 = vmatpush.bf16.msra.mxu3 %v469_v30  ;;  %v40_v41 = vld [vmem:[%s665_s2] sm:$0x3] }
   0xe   :  { %v455_v42 = vld [vmem:[%s666_s3] sm:$0xff]  ;;  %v42_v44 = vperm.slane %v40_v41, 0  ;;  %v43_v45 = vperm.slane %v40_v41, 1 }
   0xf   :  { %v463_v43 = vld [vmem:[%s666_s3 + $0x40] sm:$0xff] }
  0x10   :  { %97 = vmatpush.bf16.msra.mxu0 %v352_v22  ;;  %288 = vmatpush.bf16.msra.mxu2 %v460_v31 }
  0x11   :  { %111 = vmatpush.bf16.msra.mxu1 %v356_v25  ;;  %302 = vmatpush.bf16.msra.mxu3 %v468_v32  ;;  %v154_v30 = vld [vmem:[#allocation2] sm:$0xff] }
  0x13   :  { %381 = vmatmul.msk.bf16.vlgmr.msra.gmra.mxu0 %vm26_vm0, %v31_v26 }
  0x14   :  { %382 = vmatmul.msk.bf16.vlgmr.msra.gmra.mxu1 %vm26_vm0, %v31_v26  ;;  %289 = vmatpush.bf16.msra.mxu2 %v459_v33 }
  0x15   :  { %303 = vmatpush.bf16.msra.mxu3 %v467_v34 }
  0x18   :  { %290 = vmatpush.bf16.msra.mxu2 %v458_v35  ;;  %v155_v35 = vld [vmem:[#allocation2 + $0x8] sm:$0xff] }
  0x19   :  { %304 = vmatpush.bf16.msra.mxu3 %v466_v36 }
  0x1c   :  { %291 = vmatpush.bf16.msra.mxu2 %v457_v37 }
  0x1d   :  { %305 = vmatpush.bf16.msra.mxu3 %v465_v38  ;;  %v475_v38 = vld [vmem:[%s667_s4] ss:$0 sm:$0xff]  ;;  %s512_s4 = smov 128  }
  0x20   :  { %292 = vmatpush.bf16.msra.mxu2 %v456_v39 }
  0x21   :  { %306 = vmatpush.bf16.msra.mxu3 %v464_v40 }
  0x24   :  { %293 = vmatpush.bf16.msra.mxu2 %v455_v42 }
  0x25   :  { %307 = vmatpush.bf16.msra.mxu3 %v463_v43 }
  0x90   :  { %v99_v46 = vpop.f32.mrf.mxu0 }
  0x91   :  { %v100_v47 = vadd.f32 %v99_v46, %v42_v44  ;;  %v113_v48 = vpop.f32.mrf.mxu1 }
  0x92   :  { %v114_v49 = vadd.f32 %v113_v48, %v43_v45 }
  0x93   :  { %v122_v50 = vmul.f32 0.044715, %v100_v47  ;;  %v118_v16 = vmul.f32 0.5, %v100_v47 }
  0x94   :  { %v123_v51 = vmul.f32 0.044715, %v114_v49  ;;  %v119_v19 = vmul.f32 0.5, %v114_v49 }
  0x95   :  { %v126_v52 = vmul.f32 %v122_v50, %v100_v47 }
  0x96   :  { %v127_v53 = vmul.f32 %v123_v51, %v114_v49 }
  0x97   :  { %v130_v54 = vmul.f32 %v126_v52, %v100_v47 }
  0x98   :  { %v101_v55 = vpop.f32.mrf.mxu0  ;;  %v131_v56 = vmul.f32 %v127_v53, %v114_v49 }
  0x99   :  { %v102_v57 = vadd.f32 %v101_v55, %v42_v44  ;;  %v115_v58 = vpop.f32.mrf.mxu1  ;;  %v134_v59 = vadd.f32 %v130_v54, %v100_v47 }
  0x9a   :  { %v116_v60 = vadd.f32 %v115_v58, %v43_v45  ;;  %v135_v61 = vadd.f32 %v131_v56, %v114_v49 }
  0x9b   :  { %v124_v62 = vmul.f32 0.044715, %v102_v57  ;;  %v138_v1 = vmul.f32 0.7978846, %v134_v59  ;;  %v120_v17 = vmul.f32 0.5, %v102_v57 }
  0x9c   :  { %v125_v63 = vmul.f32 0.044715, %v116_v60  ;;  %v139_v3 = vmul.f32 0.7978846, %v135_v61  ;;  %v121_v20 = vmul.f32 0.5, %v116_v60 }
  0x9d   :  { %v128_v0 = vmul.f32 %v124_v62, %v102_v57  ;;  %476 = vtanh.f32 %v138_v1 }
  0x9e   :  { %v129_v2 = vmul.f32 %v125_v63, %v116_v60  ;;  %478 = vtanh.f32 %v139_v3 }
  0x9f   :  { %v132_v4 = vmul.f32 %v128_v0, %v102_v57 }
  0xa0   :  { %v133_v5 = vmul.f32 %v129_v2, %v116_v60 }
  0xa1   :  { %v136_v6 = vadd.f32 %v132_v4, %v102_v57 }
  0xa2   :  { %v137_v7 = vadd.f32 %v133_v5, %v116_v60 }
  0xa3   :  { %v140_v8 = vmul.f32 0.7978846, %v136_v6  ;;  %v477_v10 = vpop.eup %476 }
  0xa4   :  { %v141_v9 = vmul.f32 0.7978846, %v137_v7  ;;  %v479_v11 = vpop.eup %478  ;;  %v146_v12 = vadd.f32 1.0, %v477_v10 }
  0xa5   :  { %480 = vtanh.f32 %v140_v8  ;;  %v147_v14 = vadd.f32 1.0, %v479_v11 }
  0xa6   :  { %482 = vtanh.f32 %v141_v9  ;;  %v150_v22 = vmul.f32 %v146_v12, %v118_v16 }
  0xa7   :  { %v151_v24 = vmul.f32 %v147_v14, %v119_v19 }
  0xab   :  { %v481_v13 = vpop.eup %480 }
  0xac   :  { %v483_v15 = vpop.eup %482  ;;  %v148_v18 = vadd.f32 1.0, %v481_v13 }
  0xad   :  { %v149_v21 = vadd.f32 1.0, %v483_v15 }
  0xae   :  { %v152_v23 = vmul.f32 %v148_v18, %v120_v17 }
  0xaf   :  { %v153_v25 = vmul.f32 %v149_v21, %v121_v20 }
  0xb0   :  { %v156_v26 = vpack.c.bf16 %v152_v23, %v150_v22 }
  0xb1   :  { %v157_v27 = vpack.c.bf16 %v153_v25, %v151_v24 }
  0xb2   :  { %294 = vmatmul.bf16.vlgmr.msra.gmra.mxu2 %v156_v26 }
  0xb3   :  { %308 = vmatmul.bf16.vlgmr.msra.gmra.mxu3 %v157_v27 }
 0x135   :  { %v295_v29 = vpop.f32.mrf.mxu2 }
 0x136   :  { %v309_v31 = vpop.f32.mrf.mxu3 }
 0x137   :  { %v310_v32 = vadd.f32 %v309_v31, %v295_v29 }
 0x139   :  { %v314_v33 = vadd.f32 %v310_v32, %v154_v30 }
 0x13b   :  { %316 = vst.msk [vmem:[#allocation2] sm:$0xff] %vm26_vm0, %v314_v33 }
 0x13d   :  { %v297_v34 = vpop.f32.mrf.mxu2 }
 0x13e   :  { %v311_v36 = vpop.f32.mrf.mxu3 }
 0x13f   :  { %v312_v37 = vadd.f32 %v311_v36, %v297_v34 }
 0x141   :  { %v315_v39 = vadd.f32 %v312_v37, %v155_v35 }
 0x142   :  { %v321_v40 = vld [vmem:[#allocation2] sm:$0xff] }
 0x143   :  { %317 = vst.msk [vmem:[#allocation2 + $0x8] sm:$0xff] %vm26_vm0, %v315_v39  ;;  %v327_v41 = vadd.f32 %v475_v38, %v321_v40 }
 0x145   :  { %329 = vst.msk [vmem:[#allocation3] sm:$0xff] %vm26_vm0, %v327_v41 }
 0x14a   :  { %v322_v42 = vld [vmem:[#allocation2 + $0x8] sm:$0xff] }
 0x14b   :  { %v328_v43 = vadd.f32 %v475_v38, %v322_v42 }
 0x14d   :  { %330 = vst.msk [vmem:[#allocation3 + $0x8] sm:$0xff] %vm26_vm0, %v328_v43 }
 0x14e   :  { %343 = dma.vmem_to_hbm [thread:$0]  %s336_s10, 256, %s338_s13, [#allocation4], %s512_s4, %s512_s4, %s513_s14  }
 0x14f   :  { %508 = dma.done.wait [#allocation4], 256  }
 0x150   :  { %509 = vsyncadd [#allocation4], 4294967040 }
 0x151   :  { %348 = vsyncpa [#allocation4], 1 }

</bundles_post_ra>
